<compile_context>
chip_gen: v5e
topology: v5e:2x2
jax: 0.10.0
libtpu: 0.0.40
codegen_flags: <defaults>
</compile_context>

<pallas_src>
import functools

import jax
import jax.numpy as jnp
from jax.experimental import pallas as pl
from jax.experimental.pallas import tpu as pltpu


def mv_encoder_kernel(x_ref, neigh_ref,
                      embed_ref, wu_ref, an_ref, expand_ref,
                      wv_ref, av_ref, fc1_ref, fc2_ref, fcb_ref,
                      out_ref, *, K):
    """One node-block.  All contractions are flat 2-D jnp.dot -> MXU."""
    f32 = jnp.float32
    x = x_ref[...]                      # (NB, F)   compute dtype (bf16 default / f32)
    cd = x.dtype
    NB = x.shape[0]
    neigh = neigh_ref[...]              # (NB*K, V*F) compute dtype, already flat
    V, W = expand_ref.shape             # W = V*U + V*A (fused width)

    def mxu(a, b_ref):
        return jnp.dot(a.astype(cd), b_ref[...], preferred_element_type=f32)

    # ---- node_embed = inputs @ embed_trans --------------------------------- (NB, E)
    node_embed = mxu(x, embed_ref)

    # ---- fused per-view projection: [neigh@wu | neigh@wu@wn] ---------------- (NB*K, W)
    full = mxu(neigh, wu_ref)           # cols [:V*U] = neigh_u, cols [V*U:] = pre-tanh scores

    # ---- NeighborEncoder: tanh attention, softmax over K neighbors (per view)
    # an_ref has zero rows for the first V*U columns, so only the wn half contributes.
    s = mxu(jnp.tanh(full), an_ref).reshape(NB, K, V)           # (NB, K, V)
    s = s - jnp.max(s, axis=1, keepdims=True)
    p = jnp.exp(s)
    inv_den = pl.reciprocal(jnp.sum(p, axis=1, keepdims=True), approx=True)
    attn = (p * inv_den).reshape(NB * K, V)                     # (NB*K, V)

    # expand_ref broadcasts per-view weights onto the V*U columns (zeros on the wn columns),
    # so the wn half of `full` is masked out before the K-sum.
    attn_rep = mxu(attn, expand_ref)                            # (NB*K, W)
    nve = (attn_rep * full).reshape(NB, K, W).sum(axis=1)       # (NB, W)  (wn cols are 0)

    # ---- ViewAttention: tanh attention, softmax over V views ---------------- (NB, V)
    h2 = jnp.tanh(mxu(nve, wv_ref))                             # (NB, V*A)  (wv zero-padded rows)
    s2 = mxu(h2, av_ref)                                        # (NB, V)
    s2 = s2 - jnp.max(s2, axis=-1, keepdims=True)
    p2 = jnp.exp(s2)
    attn2 = p2 / jnp.sum(p2, axis=-1, keepdims=True)            # exact recip: tiny, accuracy-critical

    attn2_rep = mxu(attn2, expand_ref)                          # (NB, W)
    pooled = attn2_rep * nve                                    # (NB, W)

    # ---- fc(concat([node_embed, node_u_embed @ trans_w])) -------------------
    # trans_w is pre-folded into fc2 (fc2 = V stacked copies of trans_w @ fc_w2, zero-padded rows):
    #   pooled @ fc2  ==  (sum_v attn2_v * nve_v) @ trans_w @ fc_w2
    y = mxu(node_embed, fc1_ref) + mxu(pooled, fc2_ref) + fcb_ref[...]

    # ---- F.normalize(dim=1):  y / max(||y||, 1e-12)  == y * rsqrt(max(sumsq, 1e-24))
    inv_norm = jax.lax.rsqrt(jnp.maximum(jnp.sum(y * y, axis=-1, keepdims=True), 1e-24))
    out_ref[...] = (y * inv_norm).astype(out_ref.dtype)


def _block_diag(blocks):
    r, c = blocks[0].shape
    n = len(blocks)
    out = jnp.zeros((n * r, n * c), dtype=jnp.float32)
    for v, b in enumerate(blocks):
        out = out.at[v * r:(v + 1) * r, v * c:(v + 1) * c].set(b)
    return out


def mv_encoder(inputs, node_neigh, params, *, node_block=None,
               compute_dtype=jnp.bfloat16):
    N, F = inputs.shape
    _, V, K, _ = node_neigh.shape
    E = params['embed_trans'].shape[1]
    U = params['u_embed_trans'].shape[2]
    A = params['wn'].shape[1]
    VU, VA = V * U, V * A
    W = VU + VA
    cd = compute_dtype

    # ---- node_block selection --------------------------------------------------------------
    # Large blocks amortize the ~0.35us/step pipeline overhead; keep grid >= 2 (ideally even)
    # so both v7x TensorCores get work.  At scale, sweep 512/1024.
    if node_block is None:
        if N <= 2048 and N % 2 == 0 and (N // 2) % 8 == 0:
            node_block = N // 2                      # grid=(2,): one step per TensorCore
        else:
            node_block = N
            for cand in (1024, 512, 256, 128, 64, 32, 16, 8):
                if N % cand == 0:
                    node_block = cand
                    break
    NB = node_block
    assert N % NB == 0, "N must be divisible by node_block"

    # ---- wrapper-side weight fusion (done once, outside the kernel) -------------------------
    ut = params['u_embed_trans']
    wu_bd = _block_diag([ut[v] for v in range(V)])                           # (V*F, V*U)
    wn_bd = _block_diag([params['wn']] * V)                                  # (V*U, V*A)
    # fused RHS: [wu | wu @ wn]  -> one matmul produces neigh_u AND the pre-tanh scores
    wu_full = jnp.concatenate([wu_bd, wu_bd @ wn_bd], axis=1).astype(cd)     # (V*F, W)

    an_bd = _block_diag([params['an'].reshape(A, 1)] * V)                    # (V*A, V)
    an_pad = jnp.concatenate([jnp.zeros((VU, V), jnp.float32), an_bd],
                             axis=0).astype(cd)                              # (W, V)

    wv_bd = _block_diag([params['wv']] * V)                                  # (V*U, V*A)
    wv_pad = jnp.concatenate([wv_bd, jnp.zeros((VA, VA), jnp.float32)],
                             axis=0).astype(cd)                              # (W, V*A)

    av_bd = _block_diag([params['av'].reshape(A, 1)] * V).astype(cd)         # (V*A, V)

    expand_full = jnp.concatenate(
        [_block_diag([jnp.ones((1, U), jnp.float32)] * V),
         jnp.zeros((V, VA), jnp.float32)], axis=1).astype(cd)                # (V, W)

    embed_trans = params['embed_trans'].astype(cd)                           # (F, E)
    fc_w1 = params['fc_w1'].astype(cd)                                       # (E, E)
    fc2_full = jnp.tile(params['trans_weights'] @ params['fc_w2'], (V, 1))   # (V*U, E)
    fc2_pad = jnp.concatenate([fc2_full, jnp.zeros((VA, E), jnp.float32)],
                              axis=0).astype(cd)                             # (W, E)
    fc_b = params['fc_b'].astype(jnp.float32)                                # (1, E)

    # inputs in compute dtype; neighbors pre-flattened to a 2-D (N*K, V*F) slab
    x = inputs.astype(cd)
    neigh = node_neigh.transpose(0, 2, 1, 3).reshape(N * K, V * F).astype(cd)

    weights = (embed_trans, wu_full, an_pad, expand_full, wv_pad, av_bd,
               fc_w1, fc2_pad, fc_b)

    def full_spec(a):
        nd = a.ndim
        return pl.BlockSpec(a.shape, lambda i, _nd=nd: (0,) * _nd)

    grid_spec = pltpu.PrefetchScalarGridSpec(
        num_scalar_prefetch=0,
        grid=(N // NB,),
        in_specs=[pl.BlockSpec((NB, F), lambda i: (i, 0)),
                  pl.BlockSpec((NB * K, V * F), lambda i: (i, 0))]
                 + [full_spec(w) for w in weights],
        out_specs=pl.BlockSpec((NB, E), lambda i: (i, 0)),
    )

    # VMEM budget: 2x (double-buffer) per-step tiles + weights + f32 intermediates + headroom.
    # Capped at 48 MiB (leaves compiler headroom inside v7x's 64 MiB per-TC VMEM).
    item = jnp.dtype(cd).itemsize
    tile_bytes = NB * F * item + NB * K * V * F * item + NB * E * 4
    weight_bytes = sum(int(w.size) * w.dtype.itemsize for w in weights)
    interm_bytes = NB * K * (3 * W + 3 * V) * 4 + NB * (3 * W + 3 * E + 2 * V) * 4
    vmem_limit = int(min(max(2 * (tile_bytes + weight_bytes) + interm_bytes + (8 << 20),
                             16 << 20),
                         48 << 20))

    return pl.pallas_call(
        functools.partial(mv_encoder_kernel, K=K),
        out_shape=jax.ShapeDtypeStruct((N, E), jnp.float32),
        grid_spec=grid_spec,
        compiler_params=pltpu.CompilerParams(
            dimension_semantics=("parallel",),
            vmem_limit_bytes=vmem_limit),
    )(x, neigh, *weights)


def reference(inputs, node_neigh, params):
    node_embed = inputs @ params['embed_trans']
    neigh_u = jnp.einsum('nvkf,vfu->nvku', node_neigh, params['u_embed_trans'])
    h = jnp.tanh(jnp.einsum('nvku,ua->nvka', neigh_u, params['wn']))
    attn = jax.nn.softmax(jnp.sum(h * params['an'][0], -1), axis=-1)
    nve = jnp.sum(attn[..., None] * neigh_u, axis=2)
    h2 = jnp.tanh(jnp.einsum('nvu,ua->nva', nve, params['wv']))
    attn2 = jax.nn.softmax(jnp.sum(h2 * params['av'][0], -1), axis=-1)
    nue = jnp.sum(attn2[..., None] * nve, axis=1)
    y = (node_embed @ params['fc_w1'] + (nue @ params['trans_weights']) @ params['fc_w2']
         + params['fc_b'][0])
    return y / jnp.maximum(jnp.linalg.norm(y, axis=1, keepdims=True), 1e-12)


def xavier_normal(key, shape, fan_in, fan_out, gain=1.414):
    std = gain * (2.0 / (fan_in + fan_out)) ** 0.5
    return std * jax.random.normal(key, shape, dtype=jnp.float32)


if __name__ == "__main__":
    # Small deterministic config consistent with the module's __init__ / forward.
    N, F, E, U, V, K, A = 16, 16, 32, 16, 3, 8, 8

    key = jax.random.PRNGKey(0)
    ks = jax.random.split(key, 12)

    params = {
        'embed_trans':   xavier_normal(ks[0], (F, E), F, E),
        'u_embed_trans': xavier_normal(ks[1], (V, F, U), F * U, V * U),
        'wn':            xavier_normal(ks[2], (U, A), U, A),
        'an':            xavier_normal(ks[3], (1, A), A, 1),
        'wv':            xavier_normal(ks[4], (U, A), U, A),
        'av':            xavier_normal(ks[5], (1, A), A, 1),
        'trans_weights': xavier_normal(ks[6], (U, E), U, E),
        # nn.Linear(2E, E): out = x @ W.T + b ; W.T is (2E, E), split row-wise
        'fc_w1':         xavier_normal(ks[7], (E, E), 2 * E, E),
        'fc_w2':         xavier_normal(ks[8], (E, E), 2 * E, E),
        'fc_b':          0.01 * jax.random.normal(ks[9], (1, E), dtype=jnp.float32),
    }

    inputs = jax.random.normal(ks[10], (N, F), dtype=jnp.float32)
    node_neigh = jax.random.normal(ks[11], (N, V, K, F), dtype=jnp.float32)

    ref = reference(inputs, node_neigh, params)

    # default path: bf16 MXU operands (native on v5e/v6e/v7x), f32 accumulation
    out16 = jax.block_until_ready(mv_encoder(inputs, node_neigh, params))
    assert out16.shape == (N, E)
    err16 = float(jnp.max(jnp.abs(out16 - ref)))
    assert jnp.allclose(out16, ref, atol=5e-2, rtol=5e-2), err16

    # full f32 path for a tight numerical check
    out32 = jax.block_until_ready(
        mv_encoder(inputs, node_neigh, params, compute_dtype=jnp.float32))
    err32 = float(jnp.max(jnp.abs(out32 - ref)))
    assert jnp.allclose(out32, ref, atol=5e-3, rtol=5e-3), err32

    print("KERNEL_OK")
</pallas_src>

<mosaic_0001>
module attributes {stable_mosaic.version = 11 : i64} {
  func.func @mv_encoder_kernel(%arg0: i32, %arg1: memref<8x16xbf16, #tpu.memory_space<vmem>>, %arg2: memref<64x48xbf16, #tpu.memory_space<vmem>>, %arg3: memref<16x32xbf16, #tpu.memory_space<vmem>>, %arg4: memref<48x72xbf16, #tpu.memory_space<vmem>>, %arg5: memref<72x3xbf16, #tpu.memory_space<vmem>>, %arg6: memref<3x72xbf16, #tpu.memory_space<vmem>>, %arg7: memref<72x24xbf16, #tpu.memory_space<vmem>>, %arg8: memref<24x3xbf16, #tpu.memory_space<vmem>>, %arg9: memref<32x32xbf16, #tpu.memory_space<vmem>>, %arg10: memref<72x32xbf16, #tpu.memory_space<vmem>>, %arg11: memref<1x32xf32, #tpu.memory_space<vmem>>, %arg12: memref<8x32xf32, #tpu.memory_space<vmem>>) attributes {dimension_semantics = [#tpu.dimension_semantics<parallel>], iteration_bounds = array<i64: 2>, scalar_prefetch = 0 : i64, scratch_operands = 0 : i64, tpu.core_type = #tpu.core_type<tc>, window_params = [{transform_indices = @transform_0, window_bounds = array<i64: 8, 16>}, {transform_indices = @transform_1, window_bounds = array<i64: 64, 48>}, {pipeline_mode = #tpu.pipeline_mode<synchronous>, transform_indices = @transform_2, window_bounds = array<i64: 16, 32>}, {pipeline_mode = #tpu.pipeline_mode<synchronous>, transform_indices = @transform_3, window_bounds = array<i64: 48, 72>}, {pipeline_mode = #tpu.pipeline_mode<synchronous>, transform_indices = @transform_4, window_bounds = array<i64: 72, 3>}, {pipeline_mode = #tpu.pipeline_mode<synchronous>, transform_indices = @transform_5, window_bounds = array<i64: 3, 72>}, {pipeline_mode = #tpu.pipeline_mode<synchronous>, transform_indices = @transform_6, window_bounds = array<i64: 72, 24>}, {pipeline_mode = #tpu.pipeline_mode<synchronous>, transform_indices = @transform_7, window_bounds = array<i64: 24, 3>}, {pipeline_mode = #tpu.pipeline_mode<synchronous>, transform_indices = @transform_8, window_bounds = array<i64: 32, 32>}, {pipeline_mode = #tpu.pipeline_mode<synchronous>, transform_indices = @transform_9, window_bounds = array<i64: 72, 32>}, {pipeline_mode = #tpu.pipeline_mode<synchronous>, transform_indices = @transform_10, window_bounds = array<i64: 1, 32>}, {transform_indices = @transform_11, window_bounds = array<i64: 8, 32>}]} {
    %c0 = arith.constant 0 : index
    %c0_0 = arith.constant 0 : index
    %0 = vector.load %arg1[%c0, %c0_0] : memref<8x16xbf16, #tpu.memory_space<vmem>>, vector<8x16xbf16>
    %c0_1 = arith.constant 0 : index
    %c0_2 = arith.constant 0 : index
    %1 = vector.load %arg2[%c0_1, %c0_2] : memref<64x48xbf16, #tpu.memory_space<vmem>>, vector<64x48xbf16>
    %c0_3 = arith.constant 0 : index
    %c0_4 = arith.constant 0 : index
    %2 = vector.load %arg3[%c0_3, %c0_4] : memref<16x32xbf16, #tpu.memory_space<vmem>>, vector<16x32xbf16>
    %cst = arith.constant dense<0.000000e+00> : vector<8x32xf32>
    %3 = tpu.matmul %0, %2, %cst {dimension_numbers = #tpu.dot_dimension_numbers<[1], [0], [0], [1], [0, 0, 1, 1], [], []>} : vector<8x16xbf16>, vector<16x32xbf16>, vector<8x32xf32> -> vector<8x32xf32>
    %c0_5 = arith.constant 0 : index
    %c0_6 = arith.constant 0 : index
    %4 = vector.load %arg4[%c0_5, %c0_6] : memref<48x72xbf16, #tpu.memory_space<vmem>>, vector<48x72xbf16>
    %cst_7 = arith.constant dense<0.000000e+00> : vector<64x72xf32>
    %5 = tpu.matmul %1, %4, %cst_7 {dimension_numbers = #tpu.dot_dimension_numbers<[1], [0], [0], [1], [0, 0, 1, 1], [], []>} : vector<64x48xbf16>, vector<48x72xbf16>, vector<64x72xf32> -> vector<64x72xf32>
    %6 = math.tanh %5 : vector<64x72xf32>
    %7 = arith.truncf %6 : vector<64x72xf32> to vector<64x72xbf16>
    %c0_8 = arith.constant 0 : index
    %c0_9 = arith.constant 0 : index
    %8 = vector.load %arg5[%c0_8, %c0_9] : memref<72x3xbf16, #tpu.memory_space<vmem>>, vector<72x3xbf16>
    %cst_10 = arith.constant dense<0.000000e+00> : vector<64x3xf32>
    %9 = tpu.matmul %7, %8, %cst_10 {dimension_numbers = #tpu.dot_dimension_numbers<[1], [0], [0], [1], [0, 0, 1, 1], [], []>} : vector<64x72xbf16>, vector<72x3xbf16>, vector<64x3xf32> -> vector<64x3xf32>
    %10 = vector.shape_cast %9 : vector<64x3xf32> to vector<8x8x3xf32>
    %cst_11 = arith.constant dense<0xFF800000> : vector<8x3xf32>
    %11 = vector.multi_reduction <maximumf>, %10, %cst_11 [1] : vector<8x8x3xf32> to vector<8x3xf32>
    %12 = vector.shape_cast %11 : vector<8x3xf32> to vector<8x1x3xf32>
    %13 = vector.broadcast %12 : vector<8x1x3xf32> to vector<8x8x3xf32>
    %14 = arith.subf %10, %13 : vector<8x8x3xf32>
    %15 = math.exp %14 : vector<8x8x3xf32>
    %cst_12 = arith.constant dense<0.000000e+00> : vector<8x3xf32>
    %16 = vector.multi_reduction <add>, %15, %cst_12 [1] : vector<8x8x3xf32> to vector<8x3xf32>
    %17 = vector.shape_cast %16 : vector<8x3xf32> to vector<8x1x3xf32>
    %18 = tpu.reciprocal %17 {approx = true} : vector<8x1x3xf32> -> vector<8x1x3xf32>
    %19 = vector.broadcast %18 : vector<8x1x3xf32> to vector<8x8x3xf32>
    %20 = arith.mulf %15, %19 : vector<8x8x3xf32>
    %21 = vector.shape_cast %20 : vector<8x8x3xf32> to vector<64x3xf32>
    %22 = arith.truncf %21 : vector<64x3xf32> to vector<64x3xbf16>
    %c0_13 = arith.constant 0 : index
    %c0_14 = arith.constant 0 : index
    %23 = vector.load %arg6[%c0_13, %c0_14] : memref<3x72xbf16, #tpu.memory_space<vmem>>, vector<3x72xbf16>
    %cst_15 = arith.constant dense<0.000000e+00> : vector<64x72xf32>
    %24 = tpu.matmul %22, %23, %cst_15 {dimension_numbers = #tpu.dot_dimension_numbers<[1], [0], [0], [1], [0, 0, 1, 1], [], []>} : vector<64x3xbf16>, vector<3x72xbf16>, vector<64x72xf32> -> vector<64x72xf32>
    %25 = arith.mulf %24, %5 : vector<64x72xf32>
    %26 = vector.shape_cast %25 : vector<64x72xf32> to vector<8x8x72xf32>
    %cst_16 = arith.constant dense<0.000000e+00> : vector<8x72xf32>
    %27 = vector.multi_reduction <add>, %26, %cst_16 [1] : vector<8x8x72xf32> to vector<8x72xf32>
    %28 = arith.truncf %27 : vector<8x72xf32> to vector<8x72xbf16>
    %c0_17 = arith.constant 0 : index
    %c0_18 = arith.constant 0 : index
    %29 = vector.load %arg7[%c0_17, %c0_18] : memref<72x24xbf16, #tpu.memory_space<vmem>>, vector<72x24xbf16>
    %cst_19 = arith.constant dense<0.000000e+00> : vector<8x24xf32>
    %30 = tpu.matmul %28, %29, %cst_19 {dimension_numbers = #tpu.dot_dimension_numbers<[1], [0], [0], [1], [0, 0, 1, 1], [], []>} : vector<8x72xbf16>, vector<72x24xbf16>, vector<8x24xf32> -> vector<8x24xf32>
    %31 = math.tanh %30 : vector<8x24xf32>
    %32 = arith.truncf %31 : vector<8x24xf32> to vector<8x24xbf16>
    %c0_20 = arith.constant 0 : index
    %c0_21 = arith.constant 0 : index
    %33 = vector.load %arg8[%c0_20, %c0_21] : memref<24x3xbf16, #tpu.memory_space<vmem>>, vector<24x3xbf16>
    %cst_22 = arith.constant dense<0.000000e+00> : vector<8x3xf32>
    %34 = tpu.matmul %32, %33, %cst_22 {dimension_numbers = #tpu.dot_dimension_numbers<[1], [0], [0], [1], [0, 0, 1, 1], [], []>} : vector<8x24xbf16>, vector<24x3xbf16>, vector<8x3xf32> -> vector<8x3xf32>
    %cst_23 = arith.constant dense<0xFF800000> : vector<8xf32>
    %35 = vector.multi_reduction <maximumf>, %34, %cst_23 [1] : vector<8x3xf32> to vector<8xf32>
    %36 = vector.shape_cast %35 : vector<8xf32> to vector<8x1xf32>
    %37 = vector.broadcast %36 : vector<8x1xf32> to vector<8x3xf32>
    %38 = arith.subf %34, %37 : vector<8x3xf32>
    %39 = math.exp %38 : vector<8x3xf32>
    %cst_24 = arith.constant dense<0.000000e+00> : vector<8xf32>
    %40 = vector.multi_reduction <add>, %39, %cst_24 [1] : vector<8x3xf32> to vector<8xf32>
    %41 = vector.shape_cast %40 : vector<8xf32> to vector<8x1xf32>
    %42 = vector.broadcast %41 : vector<8x1xf32> to vector<8x3xf32>
    %43 = arith.divf %39, %42 : vector<8x3xf32>
    %44 = arith.truncf %43 : vector<8x3xf32> to vector<8x3xbf16>
    %c0_25 = arith.constant 0 : index
    %c0_26 = arith.constant 0 : index
    %45 = vector.load %arg6[%c0_25, %c0_26] : memref<3x72xbf16, #tpu.memory_space<vmem>>, vector<3x72xbf16>
    %cst_27 = arith.constant dense<0.000000e+00> : vector<8x72xf32>
    %46 = tpu.matmul %44, %45, %cst_27 {dimension_numbers = #tpu.dot_dimension_numbers<[1], [0], [0], [1], [0, 0, 1, 1], [], []>} : vector<8x3xbf16>, vector<3x72xbf16>, vector<8x72xf32> -> vector<8x72xf32>
    %47 = arith.mulf %46, %27 : vector<8x72xf32>
    %48 = arith.truncf %3 : vector<8x32xf32> to vector<8x32xbf16>
    %c0_28 = arith.constant 0 : index
    %c0_29 = arith.constant 0 : index
    %49 = vector.load %arg9[%c0_28, %c0_29] : memref<32x32xbf16, #tpu.memory_space<vmem>>, vector<32x32xbf16>
    %cst_30 = arith.constant dense<0.000000e+00> : vector<8x32xf32>
    %50 = tpu.matmul %48, %49, %cst_30 {dimension_numbers = #tpu.dot_dimension_numbers<[1], [0], [0], [1], [0, 0, 1, 1], [], []>} : vector<8x32xbf16>, vector<32x32xbf16>, vector<8x32xf32> -> vector<8x32xf32>
    %51 = arith.truncf %47 : vector<8x72xf32> to vector<8x72xbf16>
    %c0_31 = arith.constant 0 : index
    %c0_32 = arith.constant 0 : index
    %52 = vector.load %arg10[%c0_31, %c0_32] : memref<72x32xbf16, #tpu.memory_space<vmem>>, vector<72x32xbf16>
    %cst_33 = arith.constant dense<0.000000e+00> : vector<8x32xf32>
    %53 = tpu.matmul %51, %52, %cst_33 {dimension_numbers = #tpu.dot_dimension_numbers<[1], [0], [0], [1], [0, 0, 1, 1], [], []>} : vector<8x72xbf16>, vector<72x32xbf16>, vector<8x32xf32> -> vector<8x32xf32>
    %54 = arith.addf %50, %53 : vector<8x32xf32>
    %c0_34 = arith.constant 0 : index
    %c0_35 = arith.constant 0 : index
    %55 = vector.load %arg11[%c0_34, %c0_35] : memref<1x32xf32, #tpu.memory_space<vmem>>, vector<1x32xf32>
    %56 = vector.broadcast %55 : vector<1x32xf32> to vector<8x32xf32>
    %57 = arith.addf %54, %56 : vector<8x32xf32>
    %58 = arith.mulf %57, %57 : vector<8x32xf32>
    %cst_36 = arith.constant dense<0.000000e+00> : vector<8xf32>
    %59 = vector.multi_reduction <add>, %58, %cst_36 [1] : vector<8x32xf32> to vector<8xf32>
    %60 = vector.shape_cast %59 : vector<8xf32> to vector<8x1xf32>
    %cst_37 = arith.constant 1.000000e-24 : f32
    %61 = vector.broadcast %cst_37 : f32 to vector<8x1xf32>
    %62 = arith.maximumf %60, %61 : vector<8x1xf32>
    %63 = math.rsqrt %62 : vector<8x1xf32>
    %64 = vector.broadcast %63 : vector<8x1xf32> to vector<8x32xf32>
    %65 = arith.mulf %57, %64 : vector<8x32xf32>
    %c0_38 = arith.constant 0 : index
    %c0_39 = arith.constant 0 : index
    %66 = vector.load %arg12[%c0_38, %c0_39] : memref<8x32xf32, #tpu.memory_space<vmem>>, vector<8x32xf32>
    tpu.vector_store %arg12[%c0_38, %c0_39], %65 {strides = array<i32>} : memref<8x32xf32, #tpu.memory_space<vmem>>, vector<8x32xf32>,
    return
  }
  func.func @transform_0(%arg0: i32) -> (i32, i32) {
    %c0_i32 = arith.constant 0 : i32
    %c0_i32_0 = arith.constant 0 : i32
    return %arg0, %c0_i32 : i32, i32
  }
  func.func @transform_1(%arg0: i32) -> (i32, i32) {
    %c0_i32 = arith.constant 0 : i32
    %c0_i32_0 = arith.constant 0 : i32
    return %arg0, %c0_i32 : i32, i32
  }
  func.func @transform_2(%arg0: i32) -> (i32, i32) {
    %c0_i32 = arith.constant 0 : i32
    %c0_i32_0 = arith.constant 0 : i32
    %c0_i32_1 = arith.constant 0 : i32
    return %c0_i32, %c0_i32_0 : i32, i32
  }
  func.func @transform_3(%arg0: i32) -> (i32, i32) {
    %c0_i32 = arith.constant 0 : i32
    %c0_i32_0 = arith.constant 0 : i32
    %c0_i32_1 = arith.constant 0 : i32
    return %c0_i32, %c0_i32_0 : i32, i32
  }
  func.func @transform_4(%arg0: i32) -> (i32, i32) {
    %c0_i32 = arith.constant 0 : i32
    %c0_i32_0 = arith.constant 0 : i32
    %c0_i32_1 = arith.constant 0 : i32
    return %c0_i32, %c0_i32_0 : i32, i32
  }
  func.func @transform_5(%arg0: i32) -> (i32, i32) {
    %c0_i32 = arith.constant 0 : i32
    %c0_i32_0 = arith.constant 0 : i32
    %c0_i32_1 = arith.constant 0 : i32
    return %c0_i32, %c0_i32_0 : i32, i32
  }
  func.func @transform_6(%arg0: i32) -> (i32, i32) {
    %c0_i32 = arith.constant 0 : i32
    %c0_i32_0 = arith.constant 0 : i32
    %c0_i32_1 = arith.constant 0 : i32
    return %c0_i32, %c0_i32_0 : i32, i32
  }
  func.func @transform_7(%arg0: i32) -> (i32, i32) {
    %c0_i32 = arith.constant 0 : i32
    %c0_i32_0 = arith.constant 0 : i32
    %c0_i32_1 = arith.constant 0 : i32
    return %c0_i32, %c0_i32_0 : i32, i32
  }
  func.func @transform_8(%arg0: i32) -> (i32, i32) {
    %c0_i32 = arith.constant 0 : i32
    %c0_i32_0 = arith.constant 0 : i32
    %c0_i32_1 = arith.constant 0 : i32
    return %c0_i32, %c0_i32_0 : i32, i32
  }
  func.func @transform_9(%arg0: i32) -> (i32, i32) {
    %c0_i32 = arith.constant 0 : i32
    %c0_i32_0 = arith.constant 0 : i32
    %c0_i32_1 = arith.constant 0 : i32
    return %c0_i32, %c0_i32_0 : i32, i32
  }
  func.func @transform_10(%arg0: i32) -> (i32, i32) {
    %c0_i32 = arith.constant 0 : i32
    %c0_i32_0 = arith.constant 0 : i32
    %c0_i32_1 = arith.constant 0 : i32
    return %c0_i32, %c0_i32_0 : i32, i32
  }
  func.func @transform_11(%arg0: i32) -> (i32, i32) {
    %c0_i32 = arith.constant 0 : i32
    %c0_i32_0 = arith.constant 0 : i32
    return %arg0, %c0_i32 : i32, i32
  }
}

</mosaic_0001>

<bundles_post_ra>
// kernel: tpu_custom_call.1
= control target key start
LH: loop header
LB: loop body
LE: loop exit
PB: predicated region body
PF: predicated region fallthrough
CT: control target
= control target key end

     0   :  { %s1925_s0 = inlined_call_operand.vmem [shape: bf16[16,16], index: 0, kind: input, shape index: {}]   ;;  %s1926_s1 = inlined_call_operand.vmem [shape: bf16[128,48], index: 1, kind: input, shape index: {}]   ;;  %s1927_s2 = inlined_call_operand.vmem [shape: bf16[16,32], index: 2, kind: input, shape index: {}]   ;;  %s1928_s3 = inlined_call_operand.vmem [shape: bf16[48,72], index: 3, kind: input, shape index: {}]   ;;  %s1929_s4 = inlined_call_operand.vmem [shape: bf16[72,3], index: 4, kind: input, shape index: {}]   ;;  %s1930_s5 = inlined_call_operand.vmem [shape: bf16[3,72], index: 5, kind: input, shape index: {}]   ;;  %s1931_s6 = inlined_call_operand.vmem [shape: bf16[72,24], index: 6, kind: input, shape index: {}]   ;;  %s1932_s7 = inlined_call_operand.vmem [shape: bf16[24,3], index: 7, kind: input, shape index: {}]   ;;  %s1933_s8 = inlined_call_operand.vmem [shape: bf16[32,32], index: 8, kind: input, shape index: {}]   ;;  %s1934_s9 = inlined_call_operand.vmem [shape: bf16[72,32], index: 9, kind: input, shape index: {}]   ;;  %s1935_s10 = inlined_call_operand.vmem [shape: f32[1,32], index: 10, kind: input, shape index: {}]   ;;  %s1936_s11 = inlined_call_operand.hbm [shape: f32[16,32], index: 11, kind: output, shape index: {}]  }
   0x1   :  { %1937 = sst [smem:[#allocation6_spill]] %s1927_s2 }
   0x2   :  { %16 = vsyncpa [#allocation3], 0 }
   0x3   :  { %18 = vsyncpa [#allocation3 + $0x1], 0  ;;  %s1641_s17 = smov 0   ;;  %s1643_s18 = smov 0  }
   0x4   :  { %s1645_s19 = smov 0   ;;  %s1647_s20 = smov 0  }
   0x5 LB: > { %s1273_s21 = sadd.s32 4294967295, %s1578_s20   ;;  %s1274_s22 = sadd.s32 4294967294, %s1578_s20   ;;  %s1578_s20 = sphi %s1647_s20, %s1946_s20   ;;  %s1574_s19 = sphi %s1645_s19, %s1945_s19   ;;  %s1570_s18 = sphi %s1643_s18, %s1944_s18   ;;  %s1566_s17 = sphi %s1641_s17, %s1943_s17  }
   0x6   : > { %s1664_s23 = sadd.s32 1, %s1578_s20   ;;  %s272_s24 = sadd.s32 1, %s1574_s19 }
   0x7   : > { %s269_s25 = ssub.s32 %s1578_s20, %s1664_s23  ;;  %p282_p0 = scmp.ne.s32.totalorder %s1574_s19, %s1570_s18 }
   0x8   : > { %p270_p1 = scmp.eq.s32.totalorder %s269_s25, 0  ;;  %p283_p2 = scmp.eq.s32.totalorder %s1273_s21, 1 }
   0x9   : > { %p288_p3 = scmp.ne.s32.totalorder %s1570_s18, %s1566_s17  ;;  %p289_p4 = scmp.eq.s32.totalorder %s1274_s22, 1 }
   0xa   : > { %s1674_s26 = scalar_select %p270_p1, %s1574_s19, %s272_s24  }
   0xb   : > { %p1676_p5 = por %p283_p2, %p282_p0  ;;  %p1680_p6 = por %p289_p4, %p288_p3 }
   0xc   : > { %1938 = sst [smem:[#allocation5_spill]] %s1674_s26  ;;  %p1277_p7 = scmp.ge.s32.totalorder %s1578_s20, 1 }
   0xd   : > { %p350_p8 = scmp.lt.s32.totalorder %s1578_s20, 3 }
   0xf   : > { %p351_p9 = pnand %p1277_p7, %p350_p8 }
  0x10   : > { %s1941_s2 = sld [smem:[#allocation6_spill]] (!%p351_p9)  ;;  %p394_p10 = scmp.lt.s32.totalorder (!%p351_p9), %s1273_s21, 1 }
  0x11   : > { %354 = sbr.rel (%p351_p9) target bundleno = 1521 (0x5f1), region = 64  ;;  %s1692_s14 = sshll.u32 (!%p351_p9), %s1273_s21, 3 }
  0x12   : > { %p399_p11 = scmp.lt.s32.totalorder (!%p351_p9), %s1692_s14, 15 }
  0x16   : > { %v1400_v0 = vld [vmem:[%s1941_s2] sm:$0xff]  ;;  %v1403_v1 = vld [vmem:[%s1928_s3 + $0x10] sm:$0xff]  ;;  %s1948_s21 = smov (!%p394_p10, %s1273_s21), 1  ;;  %vm422_vm0 = vcmask 130048   ;;  %v1402_v2 = vld [vmem:[%s1928_s3 + $0x8] sm:$0xff]  ;;  %vm483_vm1 = vcmask 392192  }
  0x17   : > { %433 = vmatpush.bf16.msra.mxu1 %v1400_v0  ;;  %s1279_s15 = sshll.u32 %s1948_s21, 2  ;;  %v1401_v4 = vld [vmem:[%s1928_s3] sm:$0xff]  ;;  %vm586_vm2 = vcmask 1043456   ;;  %v1407_v13 = vld [vmem:[%s1929_s4 + $0x18] sm:$0xff]  ;;  %v1406_v14 = vld [vmem:[%s1929_s4 + $0x10] sm:$0xff]  ;;  %vm573_vm3 = vcmask 588800  }
  0x18   : > { %s397_s29 = scalar_lea.vmem %s1925_s0, %s1279_s15  ;;  %v545_v9 = vld [vmem:[%s1929_s4 + $0x20] sm:$0xf]  ;;  %v1405_v15 = vld [vmem:[%s1929_s4 + $0x8] sm:$0xff]  ;;  %vm619_vm4 = vcmask 23552   ;;  %vm789_vm5 = vcmask 1040384   ;;  %vm790_vm6 = vcmask 1041408  }
  0x19   : > { %v405_v3 = vld [vmem:[%s397_s29] sm:$0xf]  ;;  %s400_s13 = scalar_select %p399_p11, %s1692_s14, 15  ;;  %v563_v10 = vunpack.c.l.b16 %v545_v9  ;;  %v1580_v62 = vmov 65535   ;;  %vm922_vm7 = vcmask 1041409   ;;  %vm924_vm8 = vcmask 1042434  }
  0x1a   : > { %1286 = vmatmul.msk.bf16.vlgmr.msra.gmra.mxu1 %vm422_vm0, %v405_v3  ;;  %v1404_v16 = vld [vmem:[%s1929_s4] sm:$0xff]  ;;  %v791_v63 = vsel %vm789_vm5, 4294967295, %v1580_v62  ;;  %vm926_vm9 = vcmask 1043459   ;;  %vm928_vm10 = vcmask 1044484   ;;  %vm930_vm11 = vcmask 1045509   ;;  %s391_s29 = sand.u32 1, %s1570_s18  }
  0x1b   : > { %501 = vmatpush.bf16.msrb.mxu1 %v1403_v1  ;;  %s1281_s21 = sshll.u32 %s400_s13, 2  ;;  %v568_v11 = vpack.c.b16 %v563_v10, %v563_v10  ;;  %v776_v61 = vld [vmem:[%s1930_s5] sm:$0x3]  ;;  %v792_v0 = vsel %vm790_vm6, %v791_v63, 0  ;;  %vm932_vm12 = vcmask 1046534   ;;  %vm934_vm13 = vcmask 1047559  }
  0x1c   : > { %s402_s16 = scalar_lea.vmem %s1926_s1, %s1281_s21  ;;  %v1760_v3 = vand.u32 %v792_v0, %v776_v61  ;;  %vm997_vm14 = vcmask 195584   ;;  %s1278_s30 = sshll.u32 %s391_s29, 3 }
  0x1d   : > { %v1396_v5 = vld [vmem:[%s402_s16] sm:$0xff]  ;;  %v1397_v6 = vld [vmem:[%s402_s16 + $0x8] sm:$0xff]  ;;  %v1398_v7 = vld [vmem:[%s402_s16 + $0x10] sm:$0xff]  ;;  %v588_v12 = vsel %vm586_vm2, %v568_v11, 0  ;;  %s1198_s21 = scalar_lea.hbm %s1936_s11, %s1692_s14  ;;  %s1188_s2 = scalar_lea.sflag [#allocation3], %s391_s29 }
  0x1e   : > { %v1399_v8 = vld [vmem:[%s402_s16 + $0x18] sm:$0xff]  ;;  %593 = vmatpush.bf16.msra.mxu2 %v588_v12  ;;  %803 = vmatpush.bf16.msra.mxu3 %v1760_v3  ;;  %s393_s16 = scalar_lea.vmem [#allocation2], %s1278_s30  ;;  %s1202_s22 = sshll.u32 %s1198_s21, 4  ;;  %s1203_s22 = int_to_ptr.hbm [resolvable:$true] %s1202_s22 }
  0x1f   : > { %502 = vmatpush.bf16.msrb.mxu1 %v1402_v2  ;;  %s1200_s15 = sshll.u32 %s393_s16, 4  ;;  %s1530_s26 = sshra.s32 %s1203_s22, 4  ;;  %s1201_s15 = int_to_ptr.vmem [resolvable:$true] %s1200_s15  ;;  %s1531_s26 = int_to_ptr.hbm [resolvable:$true] %s1530_s26 }
  0x20   : > { %s1532_s24 = scalar_lea.hbm %s1531_s26, 8  ;;  %s1536_s30 = scalar_lea.hbm %s1936_s11, 16 }
  0x21   : > { %p1533_p12 = scmp.ne.s32.totalorder %s1531_s26, %s1532_s24  ;;  %p1537_p1 = scmp.lt.s32.totalorder %s1531_s26, %s1936_s11 }
  0x22   : > { %594 = vmatpush.bf16.msra.mxu2 %v1407_v13  ;;  %p1538_p2 = scmp.lt.s32.totalorder %s1536_s30, %s1532_s24 }
  0x23   : > { %503 = vmatpush.bf16.msrb.mxu1 %v1401_v4  ;;  %p1534_p13 = pnand %p1533_p12, %p1676_p5 }
  0x24   : > { %p1539_p3 = por %p1538_p2, %p1537_p1 }
  0x25   : > { %p1535_p0 = pneg %p1534_p13 }
  0x26   : > { %595 = vmatpush.bf16.msra.mxu2 %v1406_v14 }
  0x27   : > { %p1540_p4 = pnand %p1539_p3, %p1535_p0 }
  0x2a   : > { %1315 = vmatmul.msk.bf16.vlgmr.msrb.gmra.mxu1 %vm483_vm1, %v1396_v5  ;;  %596 = vmatpush.bf16.msra.mxu2 %v1405_v15 }
  0x2e   : > { %597 = vmatpush.bf16.msra.mxu2 %v1404_v16 }
  0x3a   : > { %1316 = vmatmul.msk.bf16.gmra.mxu1 %vm483_vm1, %v1397_v6 }
  0x4a   : > { %1317 = vmatmul.msk.bf16.gmra.mxu1 %vm483_vm1, %v1398_v7 }
  0x5a   : > { %1318 = vmatmul.msk.bf16.gmra.mxu1 %vm483_vm1, %v1399_v8 }
  0x97   : > { %v1724_v17 = vpop.f32.mrf.mxu1 }
  0x9f   : > { %v437_v18 = vpop.f32.mrf.mxu1 }
  0xa7   : > { %v1726_v19 = vpop.f32.mrf.mxu1 }
  0xa8   : > { %1460 = vtanh.f32 %v1726_v19 }
  0xae   : > { %v1461_v21 = vpop.eup %1460 }
  0xaf   : > { %v1729_v20 = vpop.f32.mrf.mxu1 }
  0xb0   : > { %1462 = vtanh.f32 %v1729_v20 }
  0xb6   : > { %v1463_v22 = vpop.eup %1462 }
  0xb7   : > { %v1732_v23 = vpop.f32.mrf.mxu1  ;;  %v533_v24 = vpack.c.bf16 %v1463_v22, %v1461_v21 }
  0xb8   : > { %1464 = vtanh.f32 %v1732_v23 }
  0xb9   : > { %1335 = vmatmul.msk.bf16.vlgmr.msra.gmra.mxu2 %vm573_vm3, %v533_v24 }
  0xbe   : > { %v1465_v26 = vpop.eup %1464 }
  0xbf   : > { %v1736_v25 = vpop.f32.mrf.mxu1 }
  0xc0   : > { %1466 = vtanh.f32 %v1736_v25 }
  0xc6   : > { %v1467_v27 = vpop.eup %1466 }
  0xc7   : > { %v1739_v28 = vpop.f32.mrf.mxu1  ;;  %v534_v29 = vpack.c.bf16 %v1467_v27, %v1465_v26 }
  0xc8   : > { %1468 = vtanh.f32 %v1739_v28 }
  0xc9   : > { %1336 = vmatmul.msk.bf16.gmra.mxu2 %vm573_vm3, %v534_v29 }
  0xce   : > { %v1469_v31 = vpop.eup %1468 }
  0xcf   : > { %v1743_v30 = vpop.f32.mrf.mxu1 }
  0xd0   : > { %1470 = vtanh.f32 %v1743_v30 }
  0xd6   : > { %v1471_v32 = vpop.eup %1470 }
  0xd7   : > { %v1746_v33 = vpop.f32.mrf.mxu1  ;;  %v535_v34 = vpack.c.bf16 %v1471_v32, %v1469_v31 }
  0xd8   : > { %1472 = vtanh.f32 %v1746_v33 }
  0xd9   : > { %1337 = vmatmul.msk.bf16.gmra.mxu2 %vm573_vm3, %v535_v34 }
  0xde   : > { %v1473_v36 = vpop.eup %1472 }
  0xdf   : > { %v1750_v35 = vpop.f32.mrf.mxu1 }
  0xe0   : > { %1474 = vtanh.f32 %v1750_v35 }
  0xe6   : > { %v1475_v37 = vpop.eup %1474 }
  0xe7   : > { %v536_v38 = vpack.c.bf16 %v1475_v37, %v1473_v36 }
  0xe9   : > { %1338 = vmatmul.msk.bf16.gmra.mxu2 %vm573_vm3, %v536_v38 }
 0x13c   : > { %v599_v39 = vpop.f32.mrf.mxu2 }
 0x13d   : > { %v620_v40 = vsel %vm619_vm4, %v599_v39, -inf }
 0x13e   : > { %v621_v41 = vrot.slane %v620_v40, 4 }
 0x140   : > { %v622_v42 = vmax.f32 %v620_v40, %v621_v41 }
 0x142   : > { %v623_v43 = vrot.slane %v622_v42, 2 }
 0x144   : > { %v624_v44 = vmax.f32 %v622_v42, %v623_v43  ;;  %v601_v45 = vpop.f32.mrf.mxu2 }
 0x145   : > { %v627_v46 = vsel %vm619_vm4, %v601_v45, -inf }
 0x146   : > { %v625_v47 = vrot.slane %v624_v44, 1  ;;  %v628_v48 = vrot.slane %v627_v46, 4 }
 0x148   : > { %v626_v49 = vmax.f32 %v624_v44, %v625_v47  ;;  %v629_v50 = vmax.f32 %v627_v46, %v628_v48 }
 0x14a   : > { %v676_v51 = vsub.f32 %v599_v39, %v626_v49  ;;  %v630_v52 = vrot.slane %v629_v50, 2 }
 0x14c   : > { %v684_v53 = vmul.f32 1.442695, %v676_v51  ;;  %v631_v54 = vmax.f32 %v629_v50, %v630_v52  ;;  %v604_v55 = vpop.f32.mrf.mxu2 }
 0x14d   : > { %v634_v56 = vsel %vm619_vm4, %v604_v55, -inf }
 0x14e   : > { %1476 = vpow2.f32 %v684_v53  ;;  %v632_v57 = vrot.slane %v631_v54, 1  ;;  %v635_v58 = vrot.slane %v634_v56, 4 }
 0x150   : > { %v633_v59 = vmax.f32 %v631_v54, %v632_v57  ;;  %v636_v60 = vmax.f32 %v634_v56, %v635_v58 }
 0x152   : > { %v677_v1 = vsub.f32 %v601_v45, %v633_v59  ;;  %v637_v2 = vrot.slane %v636_v60, 2 }
 0x154   : > { %v1762_v4 = vpop.eup %1476  ;;  %v686_v5 = vmul.f32 1.442695, %v677_v1  ;;  %v638_v6 = vmax.f32 %v636_v60, %v637_v2  ;;  %v606_v7 = vpop.f32.mrf.mxu2 }
 0x155   : > { %v700_v8 = vsel %vm619_vm4, %v1762_v4, 0.0  ;;  %v641_v9 = vsel %vm619_vm4, %v606_v7, -inf }
 0x156   : > { %v701_v10 = vrot.slane %v700_v8, 4  ;;  %1478 = vpow2.f32 %v686_v5  ;;  %v639_v11 = vrot.slane %v638_v6, 1  ;;  %v642_v12 = vrot.slane %v641_v9, 4 }
 0x158   : > { %v702_v13 = vadd.f32 %v701_v10, %v700_v8  ;;  %v640_v14 = vmax.f32 %v638_v6, %v639_v11  ;;  %v643_v15 = vmax.f32 %v641_v9, %v642_v12 }
 0x15a   : > { %v703_v16 = vrot.slane %v702_v13, 2  ;;  %v678_v18 = vsub.f32 %v604_v55, %v640_v14  ;;  %v644_v21 = vrot.slane %v643_v15, 2 }
 0x15c   : > { %v1479_v22 = vpop.eup %1478  ;;  %v704_v24 = vadd.f32 %v703_v16, %v702_v13  ;;  %v688_v26 = vmul.f32 1.442695, %v678_v18  ;;  %v645_v27 = vmax.f32 %v643_v15, %v644_v21  ;;  %v609_v29 = vpop.f32.mrf.mxu2 }
 0x15d   : > { %v707_v31 = vsel %vm619_vm4, %v1479_v22, 0.0  ;;  %v648_v32 = vsel %vm619_vm4, %v609_v29, -inf }
 0x15e   : > { %v708_v34 = vrot.slane %v707_v31, 4  ;;  %1480 = vpow2.f32 %v688_v26  ;;  %v646_v36 = vrot.slane %v645_v27, 1  ;;  %v649_v37 = vrot.slane %v648_v32, 4 }
 0x15f   : > { %v705_v38 = vrot.slane %v704_v24, 1 }
 0x160   : > { %v709_v39 = vadd.f32 %v708_v34, %v707_v31  ;;  %v647_v40 = vmax.f32 %v645_v27, %v646_v36  ;;  %v650_v41 = vmax.f32 %v648_v32, %v649_v37 }
 0x161   : > { %v706_v49 = vadd.f32 %v705_v38, %v704_v24 }
 0x162   : > { %v710_v42 = vrot.slane %v709_v39, 2  ;;  %v679_v43 = vsub.f32 %v606_v7, %v647_v40  ;;  %v651_v44 = vrot.slane %v650_v41, 2 }
 0x164   : > { %v1770_v45 = vpop.eup %1480  ;;  %v711_v46 = vadd.f32 %v710_v42, %v709_v39  ;;  %v690_v47 = vmul.f32 1.442695, %v679_v43  ;;  %v611_v48 = vpop.f32.mrf.mxu2  ;;  %v652_v51 = vmax.f32 %v650_v41, %v651_v44 }
 0x165   : > { %v714_v50 = vsel %vm619_vm4, %v1770_v45, 0.0  ;;  %v655_v52 = vsel %vm619_vm4, %v611_v48, -inf }
 0x166   : > { %v712_v53 = vrot.slane %v711_v46, 1  ;;  %v715_v54 = vrot.slane %v714_v50, 4  ;;  %1482 = vpow2.f32 %v690_v47  ;;  %v656_v55 = vrot.slane %v655_v52, 4 }
 0x167   : > { %v653_v56 = vrot.slane %v652_v51, 1  ;;  %1484 = vrcp.f32 %v706_v49 }
 0x168   : > { %v716_v57 = vadd.f32 %v715_v54, %v714_v50  ;;  %v657_v58 = vmax.f32 %v655_v52, %v656_v55  ;;  %v713_v59 = vadd.f32 %v712_v53, %v711_v46 }
 0x169   : > { %v654_v60 = vmax.f32 %v652_v51, %v653_v56 }
 0x16a   : > { %v717_v61 = vrot.slane %v716_v57, 2  ;;  %v658_v62 = vrot.slane %v657_v58, 2  ;;  %1486 = vrcp.f32 %v713_v59 }
 0x16b   : > { %v680_v63 = vsub.f32 %v609_v29, %v654_v60 }
 0x16c   : > { %v1483_v0 = vpop.eup %1482  ;;  %v718_v1 = vadd.f32 %v717_v61, %v716_v57  ;;  %v659_v2 = vmax.f32 %v657_v58, %v658_v62  ;;  %v614_v5 = vpop.f32.mrf.mxu2 }
 0x16d   : > { %v721_v6 = vsel %vm619_vm4, %v1483_v0, 0.0  ;;  %v692_v7 = vmul.f32 1.442695, %v680_v63  ;;  %v662_v8 = vsel %vm619_vm4, %v614_v5, -inf  ;;  %v1485_v9 = vpop.eup %1484 }
 0x16e   : > { %v722_v10 = vrot.slane %v721_v6, 4  ;;  %v660_v11 = vrot.slane %v659_v2, 1  ;;  %v663_v12 = vrot.slane %v662_v8, 4  ;;  %v719_v14 = vrot.slane %v718_v1, 1 }
 0x16f   : > { %1488 = vpow2.f32 %v692_v7  ;;  %v764_v21 = vmul.f32 %v1485_v9, %v1762_v4 }
 0x170   : > { %v1487_v13 = vpop.eup %1486  ;;  %v723_v15 = vadd.f32 %v722_v10, %v721_v6  ;;  %v661_v16 = vmax.f32 %v659_v2, %v660_v11  ;;  %v664_v18 = vmax.f32 %v662_v8, %v663_v12  ;;  %v720_v38 = vadd.f32 %v719_v14, %v718_v1 }
 0x171   : > { %v765_v24 = vmul.f32 %v1487_v13, %v1479_v22 }
 0x172   : > { %v724_v26 = vrot.slane %v723_v15, 2  ;;  %v681_v27 = vsub.f32 %v611_v48, %v661_v16  ;;  %v665_v29 = vrot.slane %v664_v18, 2 }
 0x173   : > { %v772_v31 = vpack.c.bf16 %v765_v24, %v764_v21 }
 0x174   : > { %v725_v32 = vadd.f32 %v724_v26, %v723_v15  ;;  %v694_v34 = vmul.f32 1.442695, %v681_v27  ;;  %v666_v36 = vmax.f32 %v664_v18, %v665_v29  ;;  %v616_v37 = vpop.f32.mrf.mxu2 }
 0x175   : > { %v1489_v39 = vpop.eup %1488  ;;  %v669_v40 = vsel %vm619_vm4, %v616_v37, -inf  ;;  %1339 = vmatmul.msk.bf16.vlgmr.msra.gmra.mxu3 %vm619_vm4, %v772_v31 }
 0x176   : > { %v726_v41 = vrot.slane %v725_v32, 1  ;;  %v728_v42 = vsel %vm619_vm4, %v1489_v39, 0.0  ;;  %1490 = vpow2.f32 %v694_v34  ;;  %v667_v4 = vrot.slane %v666_v36, 1 }
 0x177   : > { %v729_v22 = vrot.slane %v728_v42, 4  ;;  %v670_v43 = vrot.slane %v669_v40, 4  ;;  %1492 = vrcp.f32 %v720_v38 }
 0x178   : > { %v668_v44 = vmax.f32 %v666_v36, %v667_v4  ;;  %v727_v46 = vadd.f32 %v726_v41, %v725_v32 }
 0x179   : > { %v730_v47 = vadd.f32 %v729_v22, %v728_v42  ;;  %v671_v48 = vmax.f32 %v669_v40, %v670_v43 }
 0x17a   : > { %v682_v49 = vsub.f32 %v614_v5, %v668_v44  ;;  %1494 = vrcp.f32 %v727_v46 }
 0x17b   : > { %v731_v50 = vrot.slane %v730_v47, 2  ;;  %v672_v51 = vrot.slane %v671_v48, 2 }
 0x17c   : > { %v1491_v52 = vpop.eup %1490  ;;  %v696_v53 = vmul.f32 1.442695, %v682_v49 }
 0x17d   : > { %v732_v54 = vadd.f32 %v731_v50, %v730_v47  ;;  %v735_v55 = vsel %vm619_vm4, %v1491_v52, 0.0  ;;  %v673_v56 = vmax.f32 %v671_v48, %v672_v51  ;;  %v1493_v57 = vpop.eup %1492 }
 0x17e   : > { %v736_v58 = vrot.slane %v735_v55, 4  ;;  %1496 = vpow2.f32 %v696_v53  ;;  %v766_v1 = vmul.f32 %v1493_v57, %v1770_v45 }
 0x17f   : > { %v674_v59 = vrot.slane %v673_v56, 1  ;;  %v733_v61 = vrot.slane %v732_v54, 1 }
 0x180   : > { %v1495_v60 = vpop.eup %1494  ;;  %v737_v62 = vadd.f32 %v736_v58, %v735_v55 }
 0x181   : > { %v675_v63 = vmax.f32 %v673_v56, %v674_v59  ;;  %v767_v2 = vmul.f32 %v1495_v60, %v1483_v0  ;;  %v734_v10 = vadd.f32 %v733_v61, %v732_v54 }
 0x182   : > { %v738_v5 = vrot.slane %v737_v62, 2 }
 0x183   : > { %v683_v6 = vsub.f32 %v616_v37, %v675_v63  ;;  %v773_v7 = vpack.c.bf16 %v767_v2, %v766_v1 }
 0x184   : > { %v1497_v8 = vpop.eup %1496  ;;  %v739_v9 = vadd.f32 %v738_v5, %v737_v62 }
 0x185   : > { %v742_v11 = vsel %vm619_vm4, %v1497_v8, 0.0  ;;  %v698_v12 = vmul.f32 1.442695, %v683_v6  ;;  %1340 = vmatmul.msk.bf16.gmra.mxu3 %vm619_vm4, %v773_v7  ;;  %v905_v6 = vld [vmem:[%s1931_s6 + $0x20] sm:$0xf] }
 0x186   : > { %v740_v13 = vrot.slane %v739_v9, 1  ;;  %v743_v14 = vrot.slane %v742_v11, 4 }
 0x187   : > { %1498 = vpow2.f32 %v698_v12 }
 0x188   : > { %v744_v15 = vadd.f32 %v743_v14, %v742_v11  ;;  %v741_v16 = vadd.f32 %v740_v13, %v739_v9  ;;  %1500 = vrcp.f32 %v734_v10  ;;  %v954_v9 = vunpack.c.l.b16 %v905_v6 }
 0x18a   : > { %v745_v18 = vrot.slane %v744_v15, 2  ;;  %1502 = vrcp.f32 %v741_v16  ;;  %v959_v12 = vpack.c.b16 %v954_v9, %v954_v9 }
 0x18c   : > { %v746_v0 = vadd.f32 %v745_v18, %v744_v15  ;;  %v968_v16 = vsel %vm586_vm2, %v959_v12, 0 }
 0x18d   : > { %v1499_v45 = vpop.eup %1498  ;;  %973 = vmatpush.bf16.msra.mxu0 %v968_v16 }
 0x18e   : > { %v1501_v21 = vpop.eup %1500  ;;  %v749_v24 = vsel %vm619_vm4, %v1499_v45, 0.0  ;;  %v747_v29 = vrot.slane %v746_v0, 1 }
 0x18f   : > { %v750_v26 = vrot.slane %v749_v24, 4  ;;  %v768_v32 = vmul.f32 %v1501_v21, %v1489_v39 }
 0x190   : > { %v1503_v27 = vpop.eup %1502  ;;  %v748_v40 = vadd.f32 %v747_v29, %v746_v0  ;;  %v1411_v0 = vld [vmem:[%s1931_s6 + $0x18] sm:$0xff] }
 0x191   : > { %v751_v31 = vadd.f32 %v750_v26, %v749_v24  ;;  %v769_v34 = vmul.f32 %v1503_v27, %v1491_v52  ;;  %974 = vmatpush.bf16.msra.mxu0 %v1411_v0 }
 0x192   : > { %1504 = vrcp.f32 %v748_v40 }
 0x193   : > { %v752_v36 = vrot.slane %v751_v31, 2  ;;  %v774_v37 = vpack.c.bf16 %v769_v34, %v768_v32 }
 0x195   : > { %v753_v38 = vadd.f32 %v752_v36, %v751_v31  ;;  %1341 = vmatmul.msk.bf16.gmra.mxu3 %vm619_vm4, %v774_v37  ;;  %v1410_v31 = vld [vmem:[%s1931_s6 + $0x10] sm:$0xff] }
 0x196   : > { %975 = vmatpush.bf16.msra.mxu0 %v1410_v31 }
 0x197   : > { %v754_v41 = vrot.slane %v753_v38, 1 }
 0x198   : > { %v1505_v4 = vpop.eup %1504 }
 0x199   : > { %v755_v42 = vadd.f32 %v754_v41, %v753_v38  ;;  %v770_v43 = vmul.f32 %v1505_v4, %v1497_v8  ;;  %v1409_v38 = vld [vmem:[%s1931_s6 + $0x8] sm:$0xff]  ;;  %v1408_v4 = vld [vmem:[%s1931_s6] sm:$0xff] }
 0x19a   : > { %976 = vmatpush.bf16.msra.mxu0 %v1409_v38 }
 0x19b   : > { %1506 = vrcp.f32 %v755_v42 }
 0x19e   : > { %977 = vmatpush.bf16.msra.mxu0 %v1408_v4 }
 0x1a1   : > { %v1507_v22 = vpop.eup %1506 }
 0x1a2   : > { %v771_v44 = vmul.f32 %v1507_v22, %v1499_v45 }
 0x1a4   : > { %v775_v46 = vpack.c.bf16 %v771_v44, %v770_v43 }
 0x1a6   : > { %1342 = vmatmul.msk.bf16.gmra.mxu3 %vm619_vm4, %v775_v46 }
 0x1f8   : > { %v805_v47 = vpop.f32.mrf.mxu3 }
 0x1f9   : > { %v825_v39 = vmul.f32 %v805_v47, %v1726_v19 }
 0x1fb   : > { %v833_v48 = vsel %vm573_vm3, %v825_v39, 0.0 }
 0x1fc   : > { %v834_v49 = vrot.slane %v833_v48, 4 }
 0x1fe   : > { %v835_v50 = vadd.f32 %v834_v49, %v833_v48  ;;  %v987_v49 = vld [vmem:[%s1932_s7 + $0x8] sm:$0xf] }
 0x200   : > { %v807_v51 = vpop.f32.mrf.mxu3  ;;  %v836_v53 = vrot.slane %v835_v50, 2 }
 0x201   : > { %v826_v52 = vmul.f32 %v807_v51, %v1729_v20  ;;  %v993_v51 = vunpack.c.l.b16 %v987_v49 }
 0x202   : > { %v837_v56 = vadd.f32 %v836_v53, %v835_v50 }
 0x203   : > { %v840_v54 = vsel %vm573_vm3, %v826_v52, 0.0 }
 0x204   : > { %v841_v55 = vrot.slane %v840_v54, 4  ;;  %v838_v61 = vrot.slane %v837_v56, 1 }
 0x206   : > { %v842_v57 = vadd.f32 %v841_v55, %v840_v54  ;;  %v1794_v2 = vadd.f32 %v838_v61, %v837_v56  ;;  %v995_v54 = vpack.c.b16 %v993_v51, %v993_v51 }
 0x208   : > { %v843_v58 = vrot.slane %v842_v57, 2  ;;  %v810_v59 = vpop.f32.mrf.mxu3 }
 0x209   : > { %v827_v60 = vmul.f32 %v810_v59, %v1732_v23 }
 0x20a   : > { %v844_v62 = vadd.f32 %v843_v58, %v842_v57  ;;  %v1002_v58 = vsel %vm586_vm2, %v995_v54, 0  ;;  %v1089_v54 = vld [vmem:[%s1934_s9 + $0x20] sm:$0xf] }
 0x20b   : > { %v847_v19 = vsel %vm573_vm3, %v827_v60, 0.0  ;;  %1010 = vmatpush.bf16.msrb.mxu0 %v1002_v58 }
 0x20c   : > { %v845_v63 = vrot.slane %v844_v62, 1  ;;  %v848_v1 = vrot.slane %v847_v19, 4 }
 0x20e   : > { %v1796_v20 = vadd.f32 %v845_v63, %v844_v62  ;;  %v849_v5 = vadd.f32 %v848_v1, %v847_v19 }
 0x210   : > { %v1066_v23 = vsel %vm922_vm7, %v1796_v20, %v1794_v2  ;;  %v850_v7 = vrot.slane %v849_v5, 2  ;;  %v812_v8 = vpop.f32.mrf.mxu3 }
 0x211   : > { %v828_v10 = vmul.f32 %v812_v8, %v1736_v25 }
 0x212   : > { %v851_v11 = vadd.f32 %v850_v7, %v849_v5 }
 0x213   : > { %v854_v13 = vsel %vm573_vm3, %v828_v10, 0.0  ;;  %v889_v10 = vpack.c.bf16 %v1794_v2, %v1794_v2 }
 0x214   : > { %v852_v14 = vrot.slane %v851_v11, 1  ;;  %v855_v15 = vrot.slane %v854_v13, 4 }
 0x216   : > { %v1807_v18 = vadd.f32 %v852_v14, %v851_v11  ;;  %v856_v45 = vadd.f32 %v855_v15, %v854_v13 }
 0x218   : > { %v1067_v25 = vsel %vm924_vm8, %v1807_v18, %v1066_v23  ;;  %v857_v21 = vrot.slane %v856_v45, 2  ;;  %v815_v24 = vpop.f32.mrf.mxu3  ;;  %v890_v23 = vpack.c.bf16 %v1796_v20, %v1796_v20  ;;  %v891_v9 = vpack.c.bf16 %v1807_v18, %v1807_v18 }
 0x219   : > { %v829_v26 = vmul.f32 %v815_v24, %v1739_v28 }
 0x21a   : > { %v858_v27 = vadd.f32 %v857_v21, %v856_v45  ;;  %v915_v14 = vunpack.c.l.b16 %v890_v23  ;;  %v916_v45 = vunpack.c.l.b16 %v891_v9  ;;  %v1416_v9 = vld [vmem:[%s1934_s9 + $0x8] sm:$0xff] }
 0x21b   : > { %v861_v29 = vsel %vm573_vm3, %v829_v26, 0.0 }
 0x21c   : > { %v859_v32 = vrot.slane %v858_v27, 1  ;;  %v862_v34 = vrot.slane %v861_v29, 4 }
 0x21e   : > { %v860_v36 = vadd.f32 %v859_v32, %v858_v27  ;;  %v863_v37 = vadd.f32 %v862_v34, %v861_v29 }
 0x220   : > { %v864_v40 = vrot.slane %v863_v37, 2  ;;  %v817_v28 = vpop.f32.mrf.mxu3  ;;  %v1068_v41 = vsel %vm926_vm9, %v860_v36, %v1067_v25  ;;  %v892_v11 = vpack.c.bf16 %v860_v36, %v860_v36  ;;  %v914_v25 = vunpack.c.l.b16 %v889_v10  ;;  %v1415_v10 = vld [vmem:[%s1934_s9] sm:$0xff] }
 0x221   : > { %v830_v42 = vmul.f32 %v817_v28, %v1743_v30 }
 0x222   : > { %v865_v22 = vadd.f32 %v864_v40, %v863_v37  ;;  %v917_v20 = vunpack.c.l.b16 %v892_v11  ;;  %v923_v18 = vsel %vm922_vm7, %v915_v14, %v914_v25  ;;  %v1075_v11 = vpack.c.bf16 %v1724_v17, %v1724_v17 }
 0x223   : > { %v868_v43 = vsel %vm573_vm3, %v830_v42, 0.0  ;;  %v925_v2 = vsel %vm924_vm8, %v916_v45, %v923_v18  ;;  %v1412_v42 = vld [vmem:[%s1932_s7] sm:$0xff] }
 0x224   : > { %v866_v44 = vrot.slane %v865_v22, 1  ;;  %v869_v46 = vrot.slane %v868_v43, 4  ;;  %v927_v32 = vsel %vm926_vm9, %v917_v20, %v925_v2  ;;  %1011 = vmatpush.bf16.msrb.mxu0 %v1412_v42  ;;  %v1459_v45 = vld [vmem:[%s1935_s10] ss:$0 sm:$0xff] }
 0x226   : > { %v867_v47 = vadd.f32 %v866_v44, %v865_v22  ;;  %v870_v39 = vadd.f32 %v869_v46, %v868_v43 }
 0x228   : > { %v871_v48 = vrot.slane %v870_v39, 2  ;;  %v1069_v30 = vsel %vm928_vm10, %v867_v47, %v1068_v41  ;;  %v893_v13 = vpack.c.bf16 %v867_v47, %v867_v47 }
 0x229   : > { %v820_v50 = vpop.f32.mrf.mxu3 }
 0x22a   : > { %v872_v52 = vadd.f32 %v871_v48, %v870_v39  ;;  %v831_v53 = vmul.f32 %v820_v50, %v1746_v33  ;;  %v918_v24 = vunpack.c.l.b16 %v893_v13 }
 0x22c   : > { %v873_v55 = vrot.slane %v872_v52, 1  ;;  %v875_v56 = vsel %vm573_vm3, %v831_v53, 0.0  ;;  %v929_v36 = vsel %vm928_vm10, %v918_v24, %v927_v32 }
 0x22d   : > { %v876_v57 = vrot.slane %v875_v56, 4 }
 0x22e   : > { %v874_v59 = vadd.f32 %v873_v55, %v872_v52  ;;  %v1413_v52 = vld [vmem:[%s1933_s8] sm:$0xff] }
 0x22f   : > { %v877_v60 = vadd.f32 %v876_v57, %v875_v56  ;;  %v1107_v56 = vunpack.c.l.b16 %v1089_v54 }
 0x230   : > { %v1070_v61 = vsel %vm930_vm11, %v874_v59, %v1069_v30  ;;  %v894_v15 = vpack.c.bf16 %v874_v59, %v874_v59 }
 0x231   : > { %v878_v62 = vrot.slane %v877_v60, 2  ;;  %v822_v19 = vpop.f32.mrf.mxu3  ;;  %v1112_v58 = vpack.c.b16 %v1107_v56, %v1107_v56 }
 0x232   : > { %v832_v63 = vmul.f32 %v822_v19, %v1750_v35  ;;  %v919_v26 = vunpack.c.l.b16 %v894_v15 }
 0x233   : > { %v879_v1 = vadd.f32 %v878_v62, %v877_v60 }
 0x234   : > { %v882_v33 = vsel %vm573_vm3, %v832_v63, 0.0  ;;  %v931_v38 = vsel %vm930_vm11, %v919_v26, %v929_v36  ;;  %v1418_v63 = vld [vmem:[%s1934_s9 + $0x18] sm:$0xff] }
 0x235   : > { %v880_v5 = vrot.slane %v879_v1, 1  ;;  %v883_v6 = vrot.slane %v882_v33, 4 }
 0x237   : > { %v881_v7 = vadd.f32 %v880_v5, %v879_v1  ;;  %v884_v8 = vadd.f32 %v883_v6, %v882_v33  ;;  %v1417_v6 = vld [vmem:[%s1934_s9 + $0x10] sm:$0xff] }
 0x239   : > { %v885_v12 = vrot.slane %v884_v8, 2  ;;  %v1071_v35 = vsel %vm932_vm12, %v881_v7, %v1070_v61  ;;  %v895_v0 = vpack.c.bf16 %v881_v7, %v881_v7  ;;  %v1121_v61 = vsel %vm586_vm2, %v1112_v58, 0 }
 0x23a   : > { %1126 = vmatpush.bf16.msrb.mxu3 %v1121_v61  ;;  %vm1148_vm2 = vcmask 261120  }
 0x23b   : > { %v886_v16 = vadd.f32 %v885_v12, %v884_v8  ;;  %v920_v29 = vunpack.c.l.b16 %v895_v0 }
 0x23d   : > { %v887_v21 = vrot.slane %v886_v16, 1  ;;  %v933_v40 = vsel %vm932_vm12, %v920_v29, %v931_v38 }
 0x23e   : > { %1127 = vmatpush.bf16.msrb.mxu3 %v1418_v63 }
 0x23f   : > { %v888_v27 = vadd.f32 %v887_v21, %v886_v16 }
 0x241   : > { %v896_v31 = vpack.c.bf16 %v888_v27, %v888_v27  ;;  %v1848_v34 = vsel %vm934_vm13, %v888_v27, %v1071_v35 }
 0x242   : > { %1128 = vmatpush.bf16.msrb.mxu3 %v1417_v6 }
 0x243   : > { %v921_v37 = vunpack.c.l.b16 %v896_v31 }
 0x245   : > { %v935_v28 = vsel %vm934_vm13, %v921_v37, %v933_v40 }
 0x246   : > { %v936_v41 = vpack.c.b16 %v935_v28, %v935_v28  ;;  %1129 = vmatpush.bf16.msrb.mxu3 %v1416_v9 }
 0x248   : > { %1359 = vmatmul.msk.bf16.vlgmr.msra.gmra.mxu0 %vm573_vm3, %v936_v41 }
 0x249   : > { %1052 = vmatpush.bf16.msra.mxu0 %v1760_v3  ;;  %v1414_v3 = vld [vmem:[%s1933_s8 + $0x8] sm:$0xff] }
 0x24a   : > { %1130 = vmatpush.bf16.msrb.mxu3 %v1415_v10 }
 0x2c5   : > { %v979_v4 = vpop.f32.mrf.mxu0 }
 0x2c6   : > { %1508 = vtanh.f32 %v979_v4 }
 0x2cc   : > { %v1509_v22 = vpop.eup %1508 }
 0x2cd   : > { %v984_v43 = vpack.c.bf16 %v1509_v22, %v1509_v22  ;;  %v981_v44 = vpop.f32.mrf.mxu0 }
 0x2cf   : > { %1364 = vmatmul.msk.bf16.vlgmr.msrb.gmra.mxu0 %vm997_vm14, %v984_v43 }
 0x2d0   : > { %1158 = vmatpush.bf16.msrb.mxu0 %v1414_v3 }
 0x2d4   : > { %1159 = vmatpush.bf16.msrb.mxu0 %v1413_v52 }
 0x34c   : > { %v1013_v46 = vpop.f32.mrf.mxu0 }
 0x34d   : > { %v1017_v47 = vsel %vm619_vm4, %v1013_v46, -inf }
 0x34e   : > { %1018 = vmax.xlane.f32.xlu0 %v1017_v47 }
 0x354   : > { %v1015_v39 = vpop.f32.mrf.mxu0 }
 0x3c1   : > { %v1019_v48 = vpop.xlane.xlu0 %1018 }
 0x3c2   : > { %v1020_v49 = vsub.f32 %v1013_v46, %v1019_v48 }
 0x3c4   : > { %v1021_v30 = vmul.f32 1.442695, %v1020_v49 }
 0x3c6   : > { %1510 = vpow2.f32 %v1021_v30 }
 0x3cc   : > { %v1511_v50 = vpop.eup %1510 }
 0x3cd   : > { %v1023_v51 = vsel %vm619_vm4, %v1511_v50, 0.0 }
 0x3ce   : > { %1024 = vadd.xlane.f32.xlu0 %v1023_v51 }
 0x441   : > { %v1025_v53 = vpop.xlane.xlu0 %1024 }
 0x442   : > { %1512 = vrcp.f32 %v1025_v53  ;;  %v1037_v60 = vand.u32 2147483648, %v1025_v53  ;;  %v1035_v19 = vand.u32 2147483647, %v1025_v53  ;;  %vm1031_vm0 = vweird.f32 %v1025_v53 }
 0x444   : > { %v1038_v33 = vor.u32 1.1754944e-38, %v1037_v60  ;;  %vm1036_vm5 = vcmp.eq.f32.partialorder %v1035_v19, 8.507059e+37 }
 0x448   : > { %v1513_v55 = vpop.eup %1512 }
 0x449   : > { %v1027_v57 = vmul.f32 %v1513_v55, %v1025_v53  ;;  %vm1032_vm15 = vweird.f32 %v1513_v55 }
 0x44a   : > { %vm1033_vm1 = vmor %vm1031_vm0, %vm1032_vm15 }
 0x44b   : > { %v1028_v59 = vsub.f32 1.0, %v1027_v57 }
 0x44d   : > { %v1029_v62 = vmul.f32 %v1513_v55, %v1028_v59 }
 0x44f   : > { %v1030_v1 = vadd.f32 %v1513_v55, %v1029_v62 }
 0x451   : > { %v1034_v5 = vsel %vm1033_vm1, %v1513_v55, %v1030_v1 }
 0x452   : > { %v1039_v23 = vsel %vm1036_vm5, %v1038_v33, %v1034_v5 }
 0x453   : > { %v1040_v7 = vmul.f32 %v1511_v50, %v1039_v23 }
 0x455   : > { %v1041_v8 = vpack.c.bf16 %v1040_v7, %v1040_v7 }
 0x457   : > { %1365 = vmatmul.msk.bf16.vlgmr.msra.gmra.mxu0 %vm619_vm4, %v1041_v8 }
 0x467   : > { %1391 = vmatmul.msk.bf16.vlgmr.msrb.gmra.mxu0 %vm1148_vm2, %v1075_v11 }
 0x4d4   : > { %v1054_v12 = vpop.f32.mrf.mxu0 }
 0x4d5   : > { %v1074_v35 = vmul.f32 %v1848_v34, %v1054_v12 }
 0x4d7   : > { %v1080_v13 = vpack.c.bf16 %v1074_v35, %v1074_v35 }
 0x4d9   : > { %1382 = vmatmul.msk.bf16.vlgmr.msrb.gmra.mxu3 %vm573_vm3, %v1080_v13 }
 0x4dc   : > { %v1056_v14 = vpop.f32.mrf.mxu0 }
 0x4e4   : > { %v1161_v15 = vpop.f32.mrf.mxu0 }
 0x4ec   : > { %v1163_v16 = vpop.f32.mrf.mxu0 }
 0x55c   : > { %v1132_v0 = vpop.f32.mrf.mxu3 }
 0x55d   : > { %v1162_v25 = vadd.f32 %v1161_v15, %v1132_v0 }
 0x55f   : > { %v1169_v17 = vadd.f32 %v1459_v45, %v1162_v25 }
 0x561   : > { %v1170_v20 = vmul.f32 %v1169_v17, %v1169_v17 }
 0x563   : > { %v1171_v21 = vsel %vm1148_vm2, %v1170_v20, 0.0 }
 0x564   : > { %v1134_v24 = vpop.f32.mrf.mxu3  ;;  %1172 = vadd.xlane.f32.xlu1 %v1171_v21 }
 0x5d7   : > { %v1173_v18 = vpop.xlane.xlu1 %1172 }
 0x5d8   : > { %v1174_v26 = vmax.f32 %v1173_v18, 1e-24 }
 0x5da   : > { %1514 = vrsqrt.f32 %v1174_v26  ;;  %vm1181_vm4 = vweird.f32 %v1174_v26 }
 0x5e0   : > { %v1515_v27 = vpop.eup %1514 }
 0x5e1   : > { %v1176_v2 = vmul.f32 %v1515_v27, %v1174_v26  ;;  %vm1182_vm3 = vweird.f32 %v1515_v27 }
 0x5e2   : > { %vm1183_vm6 = vmor %vm1181_vm4, %vm1182_vm3 }
 0x5e3   : > { %v1177_v29 = vmul.f32 %v1515_v27, %v1176_v2 }
 0x5e5   : > { %v1178_v31 = vmul.f32 0.5, %v1177_v29 }
 0x5e7   : > { %v1179_v32 = vsub.f32 1.5, %v1178_v31 }
 0x5e9   : > { %v1180_v34 = vmul.f32 %v1515_v27, %v1179_v32 }
 0x5eb   : > { %v1184_v36 = vsel %vm1183_vm6, %v1515_v27, %v1180_v34 }
 0x5ec   : > { %v1185_v37 = vmul.f32 %v1184_v36, %v1169_v17 }
 0x5ee   : > { %1186 = vst.msk [vmem:[%s393_s16] sm:$0xff] %vm1148_vm2, %v1185_v37 }
 0x5ef   : > { %1543 = shalt.err (!%p1540_p4)
}
 0x5f0   : > { %1419 = dma.vmem_to_hbm [thread:$0]  (%p1676_p5), %s1201_s15, 128, %s1203_s22, %s1188_s2  }
 0x5f1 PF: > { %p1425_p7 = scmp.ge.s32.totalorder %s1578_s20, 2  ;;  %s1214_s29 = sand.u32 1, %s1566_s17  }
 0x5f2   : > { %s1215_s21 = scalar_lea.sflag [#allocation3], %s1214_s29 }
 0x5f3   : > { %p1422_p8 = pnand %p1425_p7, %p1680_p6 }
 0x5f5   : > { %p1423_p9 = pneg %p1422_p8 }
 0x5f7   : > { %1561 = dma.done.wait (%p1423_p9), %s1215_s21, 128  }
 0x5f8   : > { %1563 = vsyncadd (%p1423_p9), %s1215_s21, 4294967168  ;;  %s1942_s16 = sld [smem:[#allocation5_spill]]  ;;  %p21_p10 = scmp.ge.s32.totalorder %s1664_s23, 4  }
 0x5f9   : > { %s1943_s17 = smov %s1570_s18  ;;  %s1944_s18 = smov %s1574_s19 }
 0x5fa   : > { %s1946_s20 = smov %s1664_s23  ;;  %23 = sbr.rel (!%p21_p10) target bundleno = 5 (0x5), region = 102 }
 0x5fe   : > { %s1945_s19 = smov %s1942_s16 }
 0x5ff   :  { %1221 = vsyncpa [#allocation3], 1 }
 0x600   :  { %1223 = vsyncpa [#allocation3 + $0x1], 1 }

</bundles_post_ra>
